<compile_context>
chip_gen: v7x
topology: tpu7x:2x2x1
jax: 0.10.0
libtpu: 0.0.40
codegen_flags: <defaults>
</compile_context>

<pallas_src>
import numpy as np
import jax
import jax.numpy as jnp
from jax.experimental import pallas as pl
from jax.experimental.pallas import tpu as pltpu


# ---------------------------------------------------------------------------
# Kernel 1: streaming frame sum / mean over the (lane-folded) T axis.
# ---------------------------------------------------------------------------
def make_frame_mean_kernel(inv_T, grid_T, tail_valid, tile_T):
    inv_T = np.float32(inv_T)
    needs_tail_mask = int(tail_valid) != int(tile_T)

    def kernel(emb_ref, mean_ref, acc_ref):
        t = pl.program_id(1)

        @pl.when(t == 0)
        def _init():
            acc_ref[...] = jnp.zeros_like(acc_ref)

        if needs_tail_mask:
            # Full tiles: plain cast + sublane-axis sum.
            @pl.when(t < grid_T - 1)
            def _full():
                acc_ref[...] += jnp.sum(emb_ref[...].astype(jnp.float32), axis=1)

            # Ragged tail tile: zero the out-of-range frames BEFORE accumulating
            # (the OOB rows of the block contain garbage; no jnp.pad copy needed).
            @pl.when(t == grid_T - 1)
            def _tail():
                x = emb_ref[...].astype(jnp.float32)
                fidx = jax.lax.broadcasted_iota(jnp.int32, x.shape, 1)
                x = jnp.where(fidx < tail_valid, x, 0.0)
                acc_ref[...] += jnp.sum(x, axis=1)
        else:
            acc_ref[...] += jnp.sum(emb_ref[...].astype(jnp.float32), axis=1)

        @pl.when(t == grid_T - 1)
        def _finalize():
            mean_ref[...] = acc_ref[...] * inv_T

    return kernel


# ---------------------------------------------------------------------------
# Kernel 2: epilogue — centroids, cosine similarity, GE2E loss.
# ---------------------------------------------------------------------------
def make_ge2e_epilogue_kernel(C, N, eps=1e-8):
    eps2 = np.float32(eps * eps)

    def kernel(alpha_ref, beta_ref, cls_ref, rank_ref, half_ref,
               emb_ref, sim_ref, loss_ref):
        alpha = alpha_ref[0, 0]
        beta = beta_ref[0, 0]
        emb = emb_ref[...]                                          # (N, D) f32 frame means

        cls = cls_ref[...]                                          # (1, N) int32
        rank = rank_ref[...]                                        # (1, N) int32
        half = half_ref[...]                                        # (1, N) int32
        row_cls = jax.lax.broadcasted_iota(jnp.int32, (C, N), 0)    # (C, N)
        same_cls = cls == row_cls                                   # (C, N)
        is_enroll = rank < half                                     # (1, N)
        is_test = jnp.logical_not(is_enroll)                        # (1, N)

        # Per-class enrollment centroid = mean of enrollment rows (MXU mask matmul).
        # Classes with <2 utterances have half == 0 (no enrollment rows): centroid
        # is the zero vector and the eps clamp collapses that row to sim == beta
        # (torch's empty .mean() would give NaN — intentional, benign deviation).
        inv_half = 1.0 / jnp.maximum(half.astype(jnp.float32), 1.0)      # (1, N)
        enroll_w = jnp.where(same_cls & is_enroll, inv_half, 0.0)        # (C, N)
        centroid = jnp.dot(enroll_w, emb, preferred_element_type=jnp.float32)  # (C, D)

        # Cosine similarity with per-operand eps clamp (F.cosine_similarity):
        # rsqrt(max(sumsq, eps^2)) == 1/max(||x||, eps); rsqrt goes to the EUP slot.
        c_n = centroid * jax.lax.rsqrt(
            jnp.maximum(jnp.sum(centroid * centroid, axis=-1, keepdims=True), eps2))
        e_n = emb * jax.lax.rsqrt(
            jnp.maximum(jnp.sum(emb * emb, axis=-1, keepdims=True), eps2))
        # Contract both last dims (trans_b form): the (N, D) operand is the MXU
        # weight and needs no XLU pre-transpose.
        sim = jax.lax.dot_general(
            c_n, e_n, (((1,), (1,)), ((), ())),
            preferred_element_type=jnp.float32)                     # (C, N)
        sim = alpha * sim + beta
        sim_ref[...] = sim

        # GE2E loss per anchor class c:
        #   log(sum_{other-class test} exp(sim)) - log(sum_{same-class test} exp(sim))
        # Stable: subtract the per-row max over test columns (cancels in the
        # difference). pos and neg each get their OWN masked reduce — no
        # catastrophic cancellation from neg = total - pos.
        masked = jnp.where(is_test, sim, jnp.float32(-jnp.inf))
        row_max = jnp.max(masked, axis=1, keepdims=True)            # (C, 1)
        ex = jnp.where(is_test, jnp.exp(sim - row_max), 0.0)        # (C, N)
        pos = jnp.sum(jnp.where(same_cls, ex, 0.0), axis=1, keepdims=True)
        neg = jnp.sum(jnp.where(jnp.logical_not(same_cls), ex, 0.0),
                      axis=1, keepdims=True)
        if C == 1:
            # torch path: negative sum defaults to 1e-6 when there are no other classes.
            loss = jnp.log(jnp.float32(1e-6)) - (row_max + jnp.log(pos))
        else:
            loss = jnp.log(neg) - jnp.log(pos)
        loss_ref[0, 0] = jnp.mean(loss)

    return kernel


# ---------------------------------------------------------------------------
# Wrapper helpers.
# ---------------------------------------------------------------------------
def _lane_fold_factor(T, D):
    """Largest k <= 128//D that divides T; (N,T,D)->(N,T//k,k*D) is a free reshape."""
    if D >= 128 or T <= 1:
        return 1
    kmax = max(1, 128 // D)
    for k in range(min(kmax, T), 0, -1):
        if T % k == 0:
            return k
    return 1


def _sublane_multiple(itemsize):
    # Native sublane packing per dtype width: f32 -> 8, bf16 -> 16, int8/fp8 -> 32.
    return {4: 8, 2: 16, 1: 32}.get(int(itemsize), 8)


def _physical_vmem_bytes():
    try:
        return int(pltpu.get_tpu_info().vmem_capacity_bytes)
    except Exception:
        return 128 << 20


def _frame_mean(embeddings, frame_tile_bytes):
    """(N, T, D) input-dtype embeddings -> (N, D) f32 per-utterance frame mean."""
    N, T, D = map(int, embeddings.shape)

    # Lane folding for D < 128: full-lane-density stream (free, contiguous reshape).
    k = _lane_fold_factor(T, D)
    Tf, Dk = T // k, D * k
    folded = embeddings.reshape(N, Tf, Dk)

    # N-chunk "parallel" axis: both TensorCores on v7x, harmless elsewhere.
    # (Nc must stay a multiple of 8 because it is the sublane dim of the output block.)
    n_chunks = 2 if (N >= 16 and N % 16 == 0) else 1
    Nc = N // n_chunks

    itemsize = folded.dtype.itemsize
    sub = _sublane_multiple(itemsize)
    bytes_per_row = max(Nc * Dk * itemsize, 1)
    tT = max(1, int(frame_tile_bytes) // bytes_per_row)
    if tT >= Tf or Tf <= sub:
        tT = Tf                                  # single tile: full dim allowed
    else:
        tT = max(sub, (tT // sub) * sub)         # dtype-native sublane packing
    grid_T = pl.cdiv(Tf, tT)
    tail_valid = Tf - (grid_T - 1) * tT          # ragged tail masked in-kernel

    # Scoped VMEM: double-buffered input tile + double-buffered output block +
    # accumulator + compiler slack; capped at 3/4 of physical VMEM
    # (~48 MiB on v7x's 64 MiB, ~96 MiB on v5e/v6e's 128 MiB).
    emb_tile = Nc * tT * Dk * itemsize
    acc_bytes = Nc * Dk * 4
    needed = 2 * emb_tile + 2 * acc_bytes + acc_bytes + (1 << 20)
    cap = (_physical_vmem_bytes() * 3) // 4
    vmem_limit = int(min(max(needed, 16 << 20), cap))

    cost = pl.CostEstimate(
        flops=int(2 * N * Tf * Dk),
        transcendentals=0,
        bytes_accessed=int(N * Tf * Dk * itemsize + N * Dk * 4),
    )

    kernel = make_frame_mean_kernel(1.0 / T, grid_T, tail_valid, tT)
    mean_folded = pl.pallas_call(
        kernel,
        out_shape=jax.ShapeDtypeStruct((N, Dk), jnp.float32),
        grid=(n_chunks, grid_T),
        # NOTE: pipeline_mode=pl.Buffered(3) on the embeddings spec is worth a
        # sweep on v7x where per-tile compute approaches per-tile DMA; depth 2
        # already hides compute on v5e/v6e, so it is left at the default here.
        in_specs=[pl.BlockSpec((Nc, tT, Dk), lambda c, t: (c, t, 0))],
        out_specs=pl.BlockSpec((Nc, Dk), lambda c, t: (c, 0)),
        scratch_shapes=[pltpu.VMEM((Nc, Dk), jnp.float32)],
        compiler_params=pltpu.CompilerParams(
            dimension_semantics=("parallel", "arbitrary"),
            vmem_limit_bytes=vmem_limit,
        ),
        cost_estimate=cost,
    )(folded)

    # Undo lane folding: tiny (N, k, D) reshape-sum on an (N, k*D) f32 array.
    if k > 1:
        return mean_folded.reshape(N, k, D).sum(axis=1)
    return mean_folded


def _ge2e_epilogue(emb_mean, cls_id, rank, half, C, alpha, beta):
    N, _ = map(int, emb_mean.shape)
    kernel = make_ge2e_epilogue_kernel(C, N, eps=1e-8)
    sim, loss = pl.pallas_call(
        kernel,
        out_shape=(
            jax.ShapeDtypeStruct((C, N), jnp.float32),   # alpha*cos+beta vs each centroid
            jax.ShapeDtypeStruct((1, 1), jnp.float32),   # mean GE2E loss
        ),
        in_specs=[
            pl.BlockSpec(memory_space=pltpu.MemorySpace.SMEM),   # alpha
            pl.BlockSpec(memory_space=pltpu.MemorySpace.SMEM),   # beta
            pl.BlockSpec(memory_space=pltpu.MemorySpace.VMEM),   # class id per utterance
            pl.BlockSpec(memory_space=pltpu.MemorySpace.VMEM),   # within-class rank
            pl.BlockSpec(memory_space=pltpu.MemorySpace.VMEM),   # enroll count of its class
            pl.BlockSpec(memory_space=pltpu.MemorySpace.VMEM),   # (N, D) frame means
        ],
        out_specs=(
            pl.BlockSpec(memory_space=pltpu.MemorySpace.VMEM),
            pl.BlockSpec(memory_space=pltpu.MemorySpace.SMEM),
        ),
    )(
        jnp.full((1, 1), alpha, jnp.float32),
        jnp.full((1, 1), beta, jnp.float32),
        jnp.asarray(cls_id).reshape(1, N),
        jnp.asarray(rank).reshape(1, N),
        jnp.asarray(half).reshape(1, N),
        emb_mean.astype(jnp.float32),
    )
    return sim, loss


def _trapezoid(y, x):
    y = np.asarray(y, dtype=np.float64)
    x = np.asarray(x, dtype=np.float64)
    return float(np.sum(0.5 * (y[1:] + y[:-1]) * (x[1:] - x[:-1])))


def _det_auc(y_true, scores):
    """DET AUC: area under (fpr, fnr) — numpy equivalent of sklearn roc_curve + auc."""
    y_true = np.asarray(y_true, dtype=np.float64)
    scores = np.asarray(scores, dtype=np.float64)
    order = np.argsort(-scores, kind="stable")
    y = y_true[order]
    s = scores[order]
    idx = np.r_[np.where(np.diff(s) != 0)[0], y.size - 1]
    tps = np.cumsum(y)[idx]
    fps = (1 + idx) - tps
    tps = np.r_[0.0, tps]
    fps = np.r_[0.0, fps]
    tpr = tps / max(tps[-1], 1e-12)
    fpr = fps / max(fps[-1], 1e-12)
    fnr = 1.0 - tpr
    return _trapezoid(fnr, fpr)


def ge2e_loss_pallas(embeddings, labels, alpha=10.0, beta=-5.0, use_alpha_beta=True,
                     frame_tile_bytes=8 << 20):
    """Returns (mean GE2E loss, DET AUC) matching GE2ELoss.forward semantics."""
    embeddings = jnp.asarray(embeddings)   # keep input dtype (no wrapper upcast)
    if embeddings.ndim == 2:
        embeddings = embeddings[:, None, :]
    if embeddings.ndim != 3:
        raise ValueError("Expected embeddings with 2 or 3 dims")
    N, T, D = map(int, embeddings.shape)

    # ---- host glue: label -> class-id / within-class rank / per-class enroll count.
    # (torch.unique / nonzero equivalent.) The kernels consume the UNSORTED
    # embeddings; class membership is reconstructed from these small arrays.
    labels_np = np.asarray(jax.device_get(labels))
    uniq = np.unique(labels_np)
    C = int(uniq.shape[0])
    cls_id = np.searchsorted(uniq, labels_np).astype(np.int32)        # (N,)
    counts = np.bincount(cls_id, minlength=C)
    order = np.argsort(cls_id, kind="stable")                         # torch nonzero order
    starts = np.cumsum(counts) - counts
    rank = np.empty(N, dtype=np.int32)
    rank[order] = (np.arange(N) - np.repeat(starts, counts)).astype(np.int32)
    half = (counts // 2).astype(np.int32)[cls_id]                     # (N,)

    if not use_alpha_beta:
        alpha, beta = 1.0, 0.0

    # ---- Kernel 1: T-streamed frame mean (lane-folded, tail-masked, N-chunked).
    emb_mean = _frame_mean(embeddings, frame_tile_bytes)               # (N, D) f32

    # ---- Kernel 2: centroids, cosine similarities, GE2E loss.
    sim, loss = _ge2e_epilogue(emb_mean, cls_id, rank, half, C, alpha, beta)

    # ---- DET AUC (sklearn roc_curve/auc) — host sort/threshold over the kernel's
    # similarity matrix; ROC is invariant to the pos-then-neg ordering of the torch loop.
    # TODO(synk): roc_curve/auc itself has no clean Pallas equivalent; done in numpy.
    sim_np = np.asarray(jax.device_get(sim))                           # (C, N)
    test_cols = rank >= half
    scores = sim_np[:, test_cols].reshape(-1)
    y_true = (cls_id[None, :] == np.arange(C, dtype=np.int32)[:, None])[:, test_cols].reshape(-1)
    det_auc = _det_auc(y_true.astype(np.int32), scores)

    return loss[0, 0], det_auc


if __name__ == "__main__":
    key = jax.random.PRNGKey(0)
    # Small shapes: 4 speakers x 4 utterances each, 8 frames, 32-dim embeddings.
    C, S, T, D = 4, 4, 8, 32
    N = C * S
    embeddings = jax.random.normal(key, (N, T, D), dtype=jnp.float32)
    # Interleaved class labels [0,1,2,3,0,1,2,3,...] exercise the unsorted-input path.
    labels = jnp.tile(jnp.arange(C, dtype=jnp.int32), S)

    loss, det_auc = ge2e_loss_pallas(embeddings, labels, alpha=10.0, beta=-5.0)
    loss = jax.block_until_ready(loss)
    _ = float(loss)
    _ = float(det_auc)
    print("KERNEL_OK")
</pallas_src>

<mosaic_0001>
module attributes {stable_mosaic.version = 11 : i64} {
  func.func @kernel(%arg0: i32, %arg1: i32, %arg2: memref<8x2x128xf32, #tpu.memory_space<vmem>>, %arg3: memref<8x128xf32, #tpu.memory_space<vmem>>, %arg4: memref<8x128xf32, #tpu.memory_space<vmem>>) attributes {dimension_semantics = [#tpu.dimension_semantics<parallel>, #tpu.dimension_semantics<arbitrary>], iteration_bounds = array<i64: 2, 1>, scalar_prefetch = 0 : i64, scratch_operands = 1 : i64, tpu.core_type = #tpu.core_type<tc>, window_params = [{transform_indices = @transform_0, window_bounds = array<i64: 8, 2, 128>}, {transform_indices = @transform_1, window_bounds = array<i64: 8, 128>}]} {
    %c0_i32 = arith.constant 0 : i32
    %0 = arith.cmpi eq, %arg1, %c0_i32 : i32
    %1 = arith.extui %0 : i1 to i32
    %c0_i32_0 = arith.constant 0 : i32
    %2 = arith.cmpi ne, %1, %c0_i32_0 : i32
    scf.if %2 {
      %cst_9 = arith.constant 0.000000e+00 : f32
      %11 = vector.broadcast %cst_9 : f32 to vector<8x128xf32>
      %c0_10 = arith.constant 0 : index
      %c0_11 = arith.constant 0 : index
      %12 = vector.load %arg4[%c0_10, %c0_11] : memref<8x128xf32, #tpu.memory_space<vmem>>, vector<8x128xf32>
      tpu.vector_store %arg4[%c0_10, %c0_11], %11 {strides = array<i32>} : memref<8x128xf32, #tpu.memory_space<vmem>>, vector<8x128xf32>,
    } else {
    }
    %c0 = arith.constant 0 : index
    %c0_1 = arith.constant 0 : index
    %3 = vector.load %arg4[%c0, %c0_1] : memref<8x128xf32, #tpu.memory_space<vmem>>, vector<8x128xf32>
    %c0_2 = arith.constant 0 : index
    %c0_3 = arith.constant 0 : index
    %c0_4 = arith.constant 0 : index
    %4 = vector.load %arg2[%c0_2, %c0_3, %c0_4] : memref<8x2x128xf32, #tpu.memory_space<vmem>>, vector<8x2x128xf32>
    %cst = arith.constant dense<0.000000e+00> : vector<8x128xf32>
    %5 = vector.multi_reduction <add>, %4, %cst [1] : vector<8x2x128xf32> to vector<8x128xf32>
    %6 = arith.addf %3, %5 : vector<8x128xf32>
    %c0_5 = arith.constant 0 : index
    %c0_6 = arith.constant 0 : index
    %7 = vector.load %arg4[%c0_5, %c0_6] : memref<8x128xf32, #tpu.memory_space<vmem>>, vector<8x128xf32>
    tpu.vector_store %arg4[%c0_5, %c0_6], %6 {strides = array<i32>} : memref<8x128xf32, #tpu.memory_space<vmem>>, vector<8x128xf32>,
    %c0_i32_7 = arith.constant 0 : i32
    %8 = arith.cmpi eq, %arg1, %c0_i32_7 : i32
    %9 = arith.extui %8 : i1 to i32
    %c0_i32_8 = arith.constant 0 : i32
    %10 = arith.cmpi ne, %9, %c0_i32_8 : i32
    scf.if %10 {
      %c0_9 = arith.constant 0 : index
      %c0_10 = arith.constant 0 : index
      %11 = vector.load %arg4[%c0_9, %c0_10] : memref<8x128xf32, #tpu.memory_space<vmem>>, vector<8x128xf32>
      %cst_11 = arith.constant 1.250000e-01 : f32
      %12 = vector.broadcast %cst_11 : f32 to vector<8x128xf32>
      %13 = arith.mulf %11, %12 : vector<8x128xf32>
      %c0_12 = arith.constant 0 : index
      %c0_13 = arith.constant 0 : index
      %14 = vector.load %arg3[%c0_12, %c0_13] : memref<8x128xf32, #tpu.memory_space<vmem>>, vector<8x128xf32>
      tpu.vector_store %arg3[%c0_12, %c0_13], %13 {strides = array<i32>} : memref<8x128xf32, #tpu.memory_space<vmem>>, vector<8x128xf32>,
    } else {
    }
    return
  }
  func.func @transform_0(%arg0: i32, %arg1: i32) -> (i32, i32, i32) {
    %c0_i32 = arith.constant 0 : i32
    %c0_i32_0 = arith.constant 0 : i32
    return %arg0, %arg1, %c0_i32 : i32, i32, i32
  }
  func.func @transform_1(%arg0: i32, %arg1: i32) -> (i32, i32) {
    %c0_i32 = arith.constant 0 : i32
    %c0_i32_0 = arith.constant 0 : i32
    return %arg0, %c0_i32 : i32, i32
  }
}

</mosaic_0001>

<bundles_post_ra>
// kernel: tpu_custom_call.1
= control target key start
LH: loop header
LB: loop body
LE: loop exit
PB: predicated region body
PF: predicated region fallthrough
CT: control target
= control target key end

     0   :  { %6 = vsyncpa [#allocation4], 0  ;;  %s739_s0 = inlined_call_operand.hbm [shape: f32[16,2,128], index: 0, kind: input, shape index: {}]   ;;  %s740_s1 = inlined_call_operand.hbm [shape: f32[16,128], index: 1, kind: output, shape index: {}]  }
   0x1   :  { %8 = vsyncpa [#allocation4 + $0x1], 0 }
   0x2   :  { %9 = vsyncpa [#allocation5], 0 }
   0x3   :  { %11 = vsyncpa [#allocation5 + $0x1], 0  ;;  %s554_s6 = smov 0   ;;  %s556_s7 = smov 0  }
   0x4   :  { %s558_s8 = smov 0   ;;  %s560_s9 = smov 0  }
   0x5   :  { %s562_s10 = smov 0   ;;  %s564_s11 = smov 0  }
   0x6 LB: > { %s347_s12 = sadd.s32 4294967295, %s538_s11   ;;  %s348_s13 = sadd.s32 4294967294, %s538_s11   ;;  %s538_s11 = sphi %s564_s11, %s17_s11   ;;  %s534_s10 = sphi %s562_s10, %s755_s10   ;;  %s530_s9 = sphi %s560_s9, %s754_s9   ;;  %s526_s8 = sphi %s558_s8, %s753_s8   ;;  %s522_s7 = sphi %s556_s7, %s752_s7   ;;  %s518_s6 = sphi %s554_s6, %s751_s6  }
   0x7   : > { %s29_s14 = sadd.s32 1, %s534_s10  ;;  %s38_s15 = sadd.s32 1, %s526_s8 }
   0x8   : > { %p31_p0 = scmp.ge.s32.totalorder %s29_s14, 2  ;;  %p45_p1 = scmp.ne.s32.totalorder %s526_s8, %s522_s7 }
   0x9   : > { %p46_p2 = scmp.eq.s32.totalorder %s538_s11, 0  ;;  %p51_p3 = scmp.ne.s32.totalorder %s522_s7, %s518_s6 }
   0xa   : > { %s757_s14 = smov (%p31_p0, %s29_s14), 0  ;;  %p52_p5 = scmp.eq.s32.totalorder %s347_s12, 0 }
   0xb   : > { %p595_p4 = por %p46_p2, %p45_p1  ;;  %s33_s17 = ssub.s32 %s534_s10, %s757_s14 }
   0xc   : > { %p75_p6 = scmp.eq.s32.totalorder %s347_s12, 1  ;;  %p36_p7 = scmp.eq.s32.totalorder %s33_s17, 0 }
   0xd   : > { %p601_p8 = por %p52_p5, %p51_p3  ;;  %p81_p10 = scmp.eq.s32.totalorder %s348_s13, 1 }
   0xe   : > { %p605_p9 = por %p75_p6, %p45_p1  ;;  %p374_p13 = scmp.lt.s32.totalorder %s538_s11, 2 }
   0xf   : > { %s610_s20 = scalar_select %p36_p7, %s526_s8, %s38_s15  }
  0x10   : > { %s744_s19 = scalar_select %p605_p9, 1, 0 }
  0x11   : > { %p612_p11 = por %p81_p10, %p51_p3  ;;  %s101_s22 = sand.u32 1, %s526_s8  }
  0x12   : > { %s351_s23 = sshll.u32 %s101_s22, 4  ;;  %s361_s24 = sshll.u32 %s534_s10, 8 }
  0x13   : > { %s745_s21 = scalar_select %p612_p11, 1, 0 }
  0x14   : > { %s623_s27 = scalar_lea.hbm %s739_s0, %s361_s24  ;;  %s105_s28 = scalar_lea.vmem [#allocation3], %s351_s23 }
  0x15   : > { %s113_s29 = sshll.u32 %s105_s28, 4  ;;  %p629_p0 = pnand %p374_p13, %p595_p4  ;;  %s625_s29 = int_to_ptr.vmem [resolvable:$true] %s113_s29 }
  0x16   : > { %s634_s2 = scalar_lea.sflag [#allocation4], %s101_s22  ;;  %s426_s3 = scalar_lea.hbm %s623_s27, 256 }
  0x17   : > { %p427_p2 = scmp.ne.s32.totalorder %s623_s27, %s426_s3  ;;  %p428_p3 = pneg %p629_p0 }
  0x18   : > { %s431_s12 = scalar_lea.hbm %s739_s0, 512  ;;  %p432_p4 = scmp.lt.u32.totalorder %s623_s27, %s739_s0 }
  0x19   : > { %p429_p5 = pnand %p428_p3, %p427_p2  ;;  %p433_p7 = scmp.lt.u32.totalorder %s431_s12, %s426_s3 }
  0x1a   : > { %p435_p13 = scmp.lt.u32.totalorder %s426_s3, %s623_s27 }
  0x1b   : > { %p430_p6 = pneg %p429_p5  ;;  %p434_p10 = por %p433_p7, %p432_p4 }
  0x1d   : > { %p436_p12 = por %p435_p13, %p434_p10 }
  0x1f   : > { %p437_p1 = pnand %p436_p12, %p430_p6 }
  0x21   : > { %440 = shalt.err (!%p437_p1)
}
  0x22   : > { %s441_s16 = scalar_lea.vmem %s625_s29, 256  ;;  %s540_s17 = smov [#allocation3]  }
  0x23   : > { %p442_p2 = scmp.ne.s32.totalorder %s625_s29, %s441_s16  ;;  %s446_s22 = sshll.u32 %s540_s17, 4  ;;  %s447_s22 = int_to_ptr.vmem [resolvable:$false] %s446_s22 }
  0x24   : > { %s448_s23 = scalar_lea.vmem %s447_s22, 512  ;;  %p449_p9 = scmp.lt.s32.totalorder %s625_s29, %s447_s22 }
  0x25   : > { %p444_p5 = pnand %p442_p2, %p428_p3  ;;  %p450_p4 = scmp.lt.s32.totalorder %s448_s23, %s441_s16 }
  0x27   : > { %p445_p11 = pneg %p444_p5  ;;  %p451_p7 = por %p450_p4, %p449_p9 }
  0x29   : > { %p452_p10 = pnand %p451_p7, %p445_p11 }
  0x2b   : > { %455 = shalt.err (!%p452_p10)
}
  0x2c   : > { %s541_s24 = smov 32   ;;  %s542_s25 = smov 2  }
  0x2d   : > { %369 = dma.hbm_to_vmem [thread:$0]  (!%p629_p0), %s623_s27, 256, %s625_s29, %s634_s2, %s541_s24, %s541_s24, %s542_s25  }
  0x2e   : > { %p121_p12 = scmp.lt.s32.totalorder %s538_s11, 3  ;;  %p747_p1 = scmp.ge.s32.totalorder %s538_s11, 1 }
  0x30   : > { %p122_p3 = pnand %p747_p1, %p121_p12 }
  0x31   : > { %s666_s26 = sand.u32 (!%p122_p3), 1, %s522_s7  }
  0x32   : > { %125 = sbr.rel (%p122_p3) target bundleno = 97 (0x61), region = 24  ;;  %s355_s28 = sshll.u32 (!%p122_p3), %s666_s26, 4 }
  0x33   : > { %s128_s3 = scalar_lea.sflag (!%p122_p3), [#allocation4], %s666_s26  ;;  %s131_s4 = scalar_lea.vmem (!%p122_p3), [#allocation3], %s355_s28 }
  0x39   : > { %509 = dma.done.wait (%p601_p8), %s128_s3, 256  }
  0x3a   : > { %511 = vsyncadd (%p601_p8), %s128_s3, 4294967040  ;;  %vm165_vm0 = vcmask 1041408   ;;  %v157_v0 = vld [vmem:[%s131_s4] sm:$0x3]  ;;  %v158_v1 = vld [vmem:[%s131_s4 + $0x2] sm:$0x3] }
  0x3b   : > { %v159_v2 = vld [vmem:[%s131_s4 + $0x4] sm:$0x3]  ;;  %v160_v3 = vld [vmem:[%s131_s4 + $0x6] sm:$0x3]  ;;  %v161_v4 = vld [vmem:[%s131_s4 + $0x8] sm:$0x3] }
  0x3c   : > { %v162_v5 = vld [vmem:[%s131_s4 + $0xa] sm:$0x3]  ;;  %v163_v6 = vld [vmem:[%s131_s4 + $0xc] sm:$0x3]  ;;  %v166_v7 = vsel %vm165_vm0, %v157_v0, 0.0  ;;  %v173_v8 = vsel %vm165_vm0, %v158_v1, 0.0 }
  0x3d   : > { %v164_v9 = vld [vmem:[%s131_s4 + $0xe] sm:$0x3]  ;;  %v167_v10 = vrot.slane %v166_v7, 4  ;;  %v174_v11 = vrot.slane %v173_v8, 4  ;;  %v180_v12 = vsel %vm165_vm0, %v159_v2, 0.0  ;;  %v187_v13 = vsel %vm165_vm0, %v160_v3, 0.0 }
  0x3e   : > { %v181_v14 = vrot.slane %v180_v12, 4  ;;  %v188_v15 = vrot.slane %v187_v13, 4  ;;  %v194_v16 = vsel %vm165_vm0, %v161_v4, 0.0  ;;  %v201_v17 = vsel %vm165_vm0, %v162_v5, 0.0  ;;  %s356_s18 = sshll.u32 %s666_s26, 3  ;;  %s358_s30 = sshll.u32 %s530_s9, 7 }
  0x3f   : > { %vm230_vm1 = vcmask 1041409   ;;  %v168_v18 = vadd.f32 %v167_v10, %v166_v7  ;;  %v175_v19 = vadd.f32 %v174_v11, %v173_v8  ;;  %v195_v20 = vrot.slane %v194_v16, 4  ;;  %s149_s27 = scalar_lea.vmem [#allocation6], %s356_s18  ;;  %s692_s12 = scalar_lea.hbm %s740_s1, %s358_s30 }
  0x40   : > { %v202_v21 = vrot.slane %v201_v17, 4  ;;  %vm232_vm2 = vcmask 1042434   ;;  %v182_v22 = vadd.f32 %v181_v14, %v180_v12  ;;  %v189_v23 = vadd.f32 %v188_v15, %v187_v13  ;;  %s267_s29 = sshll.u32 %s149_s27, 4  ;;  %s254_s13 = scalar_lea.sflag [#allocation5], %s666_s26  ;;  %s687_s29 = int_to_ptr.vmem [resolvable:$true] %s267_s29 }
  0x41   : > { %v208_v24 = vsel %vm165_vm0, %v163_v6, 0.0  ;;  %v215_v25 = vsel %vm165_vm0, %v164_v9, 0.0  ;;  %vm234_vm3 = vcmask 1043459   ;;  %v169_v26 = vrot.slane %v168_v18, 2  ;;  %s456_s15 = scalar_lea.vmem %s687_s29, 128  ;;  %p748_p9 = scmp.ne.s32.totalorder %s744_s19, 0 }
  0x42   : > { %v176_v27 = vrot.slane %v175_v19, 2  ;;  %v196_v28 = vadd.f32 %v195_v20, %v194_v16  ;;  %v203_v29 = vadd.f32 %v202_v21, %v201_v17  ;;  %v183_v30 = vrot.slane %v182_v22, 2  ;;  %p457_p8 = scmp.ne.s32.totalorder %s687_s29, %s456_s15  ;;  %s543_s9 = smov [#allocation6]  }
  0x43   : > { %v190_v31 = vrot.slane %v189_v23, 2  ;;  %v209_v32 = vrot.slane %v208_v24, 4  ;;  %v216_v33 = vrot.slane %v215_v25, 4  ;;  %v170_v34 = vadd.f32 %v169_v26, %v168_v18  ;;  %s460_s16 = sshll.u32 %s543_s9, 4  ;;  %s461_s16 = int_to_ptr.vmem [resolvable:$false] %s460_s16 }
  0x44   : > { %v177_v35 = vadd.f32 %v176_v27, %v175_v19  ;;  %v197_v36 = vrot.slane %v196_v28, 2  ;;  %v204_v37 = vrot.slane %v203_v29, 2  ;;  %v184_v38 = vadd.f32 %v183_v30, %v182_v22  ;;  %p458_p11 = pnand %p457_p8, %p748_p9  ;;  %s462_s17 = scalar_lea.vmem %s461_s16, 256 }
  0x45   : > { %v191_v39 = vadd.f32 %v190_v31, %v189_v23  ;;  %v210_v40 = vadd.f32 %v209_v32, %v208_v24  ;;  %v217_v41 = vadd.f32 %v216_v33, %v215_v25  ;;  %v171_v42 = vrot.slane %v170_v34, 1  ;;  %p463_p6 = scmp.lt.s32.totalorder %s687_s29, %s461_s16  ;;  %p464_p13 = scmp.lt.s32.totalorder %s462_s17, %s456_s15 }
  0x46   : > { %v178_v43 = vrot.slane %v177_v35, 1  ;;  %v198_v44 = vadd.f32 %v197_v36, %v196_v28  ;;  %v205_v45 = vadd.f32 %v204_v37, %v203_v29  ;;  %v185_v46 = vrot.slane %v184_v38, 1  ;;  %p459_p0 = pneg %p458_p11 }
  0x47   : > { %v192_v47 = vrot.slane %v191_v39, 1  ;;  %v211_v48 = vrot.slane %v210_v40, 2  ;;  %v218_v49 = vrot.slane %v217_v41, 2  ;;  %v172_v50 = vadd.f32 %v171_v42, %v170_v34  ;;  %p465_p2 = por %p464_p13, %p463_p6 }
  0x48   : > { %v179_v51 = vadd.f32 %v178_v43, %v177_v35  ;;  %v199_v52 = vrot.slane %v198_v44, 1  ;;  %v206_v53 = vrot.slane %v205_v45, 1  ;;  %v186_v54 = vadd.f32 %v185_v46, %v184_v38 }
  0x49   : > { %v193_v55 = vadd.f32 %v192_v47, %v191_v39  ;;  %v212_v56 = vadd.f32 %v211_v48, %v210_v40  ;;  %v219_v57 = vadd.f32 %v218_v49, %v217_v41  ;;  %vm236_vm4 = vcmask 1044484   ;;  %p466_p5 = pnand %p465_p2, %p459_p0 }
  0x4a   : > { %v200_v58 = vadd.f32 %v199_v52, %v198_v44  ;;  %v207_v59 = vadd.f32 %v206_v53, %v205_v45  ;;  %v231_v60 = vsel %vm230_vm1, %v179_v51, %v172_v50  ;;  %vm238_vm5 = vcmask 1045509  }
  0x4b   : > { %v213_v61 = vrot.slane %v212_v56, 1  ;;  %v220_v62 = vrot.slane %v219_v57, 1  ;;  %v233_v63 = vsel %vm232_vm2, %v186_v54, %v231_v60  ;;  %vm240_vm6 = vcmask 1046534  }
  0x4c   : > { %v235_v0 = vsel %vm234_vm3, %v193_v55, %v233_v63  ;;  %vm242_vm7 = vcmask 1047559  }
  0x4d   : > { %v214_v1 = vadd.f32 %v213_v61, %v212_v56  ;;  %v221_v2 = vadd.f32 %v220_v62, %v219_v57  ;;  %v237_v3 = vsel %vm236_vm4, %v200_v58, %v235_v0 }
  0x4e   : > { %v239_v4 = vsel %vm238_vm5, %v207_v59, %v237_v3 }
  0x4f   : > { %v241_v5 = vsel %vm240_vm6, %v214_v1, %v239_v4 }
  0x50   : > { %v243_v6 = vsel %vm242_vm7, %v221_v2, %v241_v5 }
  0x51   : > { %v251_v7 = vmul.f32 0.125, %v243_v6 }
  0x53   : > { %252 = vst [vmem:[%s149_s27] sm:$0xff] %v251_v7 }
  0x54   : > { %469 = shalt.err (!%p466_p5)
}
  0x55   : > { %s470_s22 = scalar_lea.hbm %s692_s12, 128  ;;  %s474_s25 = scalar_lea.hbm %s740_s1, 256 }
  0x56   : > { %p471_p4 = scmp.ne.s32.totalorder %s692_s12, %s470_s22  ;;  %p475_p12 = scmp.lt.u32.totalorder %s692_s12, %s740_s1 }
  0x57   : > { %p476_p1 = scmp.lt.u32.totalorder %s474_s25, %s470_s22  ;;  %p478_p8 = scmp.lt.u32.totalorder %s470_s22, %s692_s12 }
  0x58   : > { %p472_p7 = pnand %p471_p4, %p748_p9 }
  0x59   : > { %p477_p3 = por %p476_p1, %p475_p12 }
  0x5a   : > { %p473_p10 = pneg %p472_p7 }
  0x5b   : > { %p479_p11 = por %p478_p8, %p477_p3 }
  0x5d   : > { %p480_p0 = pnand %p479_p11, %p473_p10 }
  0x5f   : > { %483 = shalt.err (!%p480_p0)
}
  0x60   : > { %364 = dma.vmem_to_hbm [thread:$0]  (%p748_p9), %s687_s29, 128, %s692_s12, %s254_s13  }
  0x61 PF: > { %s279_s3 = sand.u32 1, %s518_s6   ;;  %p749_p6 = scmp.ne.s32.totalorder %s745_s21, 0 }
  0x62   : > { %p750_p13 = scmp.ge.s32.totalorder %s538_s11, 2  ;;  %s280_s4 = scalar_lea.sflag [#allocation5], %s279_s3 }
  0x64   : > { %p371_p2 = pnand %p750_p13, %p749_p6 }
  0x66   : > { %513 = dma.done.wait (!%p371_p2), %s280_s4, 128  }
  0x67   : > { %515 = vsyncadd (!%p371_p2), %s280_s4, 4294967168  ;;  %s17_s11 = sadd.s32 1, %s538_s11   ;;  %s751_s6 = smov %s522_s7 }
  0x68   : > { %p14_p5 = scmp.ge.s32.totalorder %s17_s11, 4   ;;  %s752_s7 = smov %s526_s8 }
  0x69   : > { %s753_s8 = smov %s610_s20  ;;  %s754_s9 = smov %s534_s10 }
  0x6a   : > { %s755_s10 = smov %s757_s14  ;;  %16 = sbr.rel (!%p14_p5) target bundleno = 6 (0x6), region = 77 }
  0x71   :  { %285 = vsyncpa [#allocation4], 1 }
  0x72   :  { %287 = vsyncpa [#allocation4 + $0x1], 1 }
  0x73   :  { %288 = vsyncpa [#allocation5], 1 }
  0x74   :  { %290 = vsyncpa [#allocation5 + $0x1], 1 }

</bundles_post_ra>
